<compile_context>
chip_gen: v7x
topology: tpu7x:2x2x1
jax: 0.10.0
libtpu: 0.0.40
codegen_flags: <defaults>
</compile_context>

<pallas_src>
import jax
import jax.numpy as jnp
from jax.experimental import pallas as pl
from jax.experimental.pallas import tpu as pltpu

HIDDEN = 128
N_ACTIONS = 5
OUT_PAD = 8          # layer-3 padded output width (8-wide f32 -> tiny writeback)
MAX_TILE_B = 4096    # upper bound on batch-tile rows
SMALL_B = 512        # below this, a single tile; latency / weight-DMA bound anyway


def wheel_dqn_kernel(x_ref, w1_ref, b1_ref, w2_ref, b2_ref, w3_ref, b3_ref, o_ref):
    # x tile: [TILE_B, n_obs] bf16 (cast once in the wrapper). MXU operands are
    # bf16 with f32 accumulation; bias/ReLU epilogue stays f32 on the VPU.
    x = x_ref[...]
    h1 = jnp.dot(x, w1_ref[...], preferred_element_type=jnp.float32) + b1_ref[...]
    h1 = jnp.maximum(h1, 0.0)  # ReLU (f32, VPU)
    h2 = jnp.dot(h1.astype(jnp.bfloat16), w2_ref[...],
                 preferred_element_type=jnp.float32) + b2_ref[...]
    h2 = jnp.maximum(h2, 0.0)  # ReLU (f32, VPU)
    # o_ref is [TILE_B, OUT_PAD] f32; real logits are cols 0..N_ACTIONS-1.
    o_ref[...] = jnp.dot(h2.astype(jnp.bfloat16), w3_ref[...],
                         preferred_element_type=jnp.float32) + b3_ref[...]


def _round_up(v, m):
    return ((v + m - 1) // m) * m


def wheel_dqn_forward(x, params):
    """x: [B, n_obs] float32; params from init_params (bf16 weights, f32 biases,
    layer-3 zero-padded to OUT_PAD columns). Returns [B, N_ACTIONS] float32."""
    B, n_obs = x.shape

    # Batch tiling:
    #  * small batches -> one 16-row-aligned tile (weight-DMA/launch latency floor),
    #  * large batches -> ~B/k-row tiles with k = max(2, ceil(B/4096)):
    #      - >= 2 grid steps so both v7x TensorCores get work,
    #      - tiles capped near 4096 rows, padding waste stays well under 10%.
    if B <= SMALL_B:
        tile_b = _round_up(max(B, 1), 16)
    else:
        k = max(2, -(-B // MAX_TILE_B))
        tile_b = _round_up(-(-B // k), 16)
    b_pad = _round_up(B, tile_b)
    grid = (b_pad // tile_b,)

    # Cast x to bf16 once (MXU operands are bf16 anyway) -> halves the x read stream.
    x = x.astype(jnp.bfloat16)
    if b_pad != B:
        x = jnp.pad(x, ((0, b_pad - B), (0, 0)))

    w1, b1 = params["w1"], params["b1"]
    w2, b2 = params["w2"], params["b2"]
    w3, b3 = params["w3"], params["b3"]  # already padded to OUT_PAD columns

    flops = 2 * b_pad * (n_obs * HIDDEN + HIDDEN * HIDDEN + HIDDEN * OUT_PAD)
    bytes_accessed = (
        b_pad * n_obs * 2                       # x (bf16)
        + (w1.size + w2.size + w3.size) * 2     # bf16 weights
        + (b1.size + b2.size + b3.size) * 4     # f32 biases
        + b_pad * OUT_PAD * 4                   # narrow f32 output
    )

    out = pl.pallas_call(
        wheel_dqn_kernel,
        out_shape=jax.ShapeDtypeStruct((b_pad, OUT_PAD), jnp.float32),
        grid_spec=pltpu.PrefetchScalarGridSpec(
            num_scalar_prefetch=0,
            grid=grid,
            in_specs=[
                pl.BlockSpec((tile_b, n_obs), lambda i: (i, 0)),   # x tile
                pl.BlockSpec((n_obs, HIDDEN), lambda i: (0, 0)),   # w1 (resident)
                pl.BlockSpec((1, HIDDEN), lambda i: (0, 0)),       # b1
                pl.BlockSpec((HIDDEN, HIDDEN), lambda i: (0, 0)),  # w2
                pl.BlockSpec((1, HIDDEN), lambda i: (0, 0)),       # b2
                pl.BlockSpec((HIDDEN, OUT_PAD), lambda i: (0, 0)), # w3 (padded 5->8)
                pl.BlockSpec((1, OUT_PAD), lambda i: (0, 0)),      # b3 (padded 5->8)
            ],
            out_specs=pl.BlockSpec((tile_b, OUT_PAD), lambda i: (i, 0)),
        ),
        compiler_params=pltpu.CompilerParams(
            dimension_semantics=("parallel",)),  # shards batch tiles across TCs (v7x)
        cost_estimate=pl.CostEstimate(
            flops=flops, transcendentals=0, bytes_accessed=bytes_accessed),
    )(x, w1, b1, w2, b2, w3, b3)

    # Drop batch padding and the zero-padded output columns.
    return out[:B, :N_ACTIONS]


def init_params(key, n_observations, hidden=HIDDEN, n_actions=N_ACTIONS):
    """Deterministic init mimicking nn.Linear default (uniform +/- 1/sqrt(fan_in)).
    Weights stored bf16 (MXU operands), biases f32. Layer-3 padded to OUT_PAD."""
    ks = jax.random.split(key, 6)

    def linear(kw, kb, fan_in, fan_out, pad_out=None):
        bound = 1.0 / jnp.sqrt(fan_in)
        w = jax.random.uniform(kw, (fan_in, fan_out), jnp.float32, -bound, bound)
        b = jax.random.uniform(kb, (1, fan_out), jnp.float32, -bound, bound)
        if pad_out is not None and pad_out > fan_out:
            w = jnp.pad(w, ((0, 0), (0, pad_out - fan_out)))
            b = jnp.pad(b, ((0, 0), (0, pad_out - fan_out)))
        return w.astype(jnp.bfloat16), b.astype(jnp.float32)

    w1, b1 = linear(ks[0], ks[1], n_observations, hidden)
    w2, b2 = linear(ks[2], ks[3], hidden, hidden)
    w3, b3 = linear(ks[4], ks[5], hidden, n_actions, pad_out=OUT_PAD)
    return {"w1": w1, "b1": b1, "w2": w2, "b2": b2, "w3": w3, "b3": b3}


def reference_forward(x, p):
    """Pure-JAX reference using the same bf16-operand / f32-accumulate math."""
    def mm(a, w):
        return jnp.dot(a.astype(jnp.bfloat16), w, preferred_element_type=jnp.float32)

    h1 = jnp.maximum(mm(x, p["w1"]) + p["b1"], 0.0)
    h2 = jnp.maximum(mm(h1, p["w2"]) + p["b2"], 0.0)
    return (mm(h2, p["w3"]) + p["b3"])[:, :N_ACTIONS]


if __name__ == "__main__":
    key = jax.random.PRNGKey(0)
    k_params, k_x = jax.random.split(key)

    batch = 2
    n_observations = 8  # e.g. 8 IR sensor readings
    params = init_params(k_params, n_observations)

    x = jax.random.normal(k_x, (batch, n_observations), dtype=jnp.float32)

    out = wheel_dqn_forward(x, params)
    out = jax.block_until_ready(out)

    ref = reference_forward(x, params)
    assert out.shape == (batch, N_ACTIONS)
    assert jnp.allclose(out, ref, atol=2e-2, rtol=2e-2), (
        f"max abs err {jnp.max(jnp.abs(out - ref))}")

    print("KERNEL_OK")
</pallas_src>

<mosaic_0001>
module attributes {stable_mosaic.version = 11 : i64} {
  func.func @wheel_dqn_kernel(%arg0: i32, %arg1: memref<16x8xbf16, #tpu.memory_space<vmem>>, %arg2: memref<8x128xbf16, #tpu.memory_space<vmem>>, %arg3: memref<1x128xf32, #tpu.memory_space<vmem>>, %arg4: memref<128x128xbf16, #tpu.memory_space<vmem>>, %arg5: memref<1x128xf32, #tpu.memory_space<vmem>>, %arg6: memref<128x8xbf16, #tpu.memory_space<vmem>>, %arg7: memref<1x8xf32, #tpu.memory_space<vmem>>, %arg8: memref<16x8xf32, #tpu.memory_space<vmem>>) attributes {dimension_semantics = [#tpu.dimension_semantics<parallel>], iteration_bounds = array<i64: 1>, scalar_prefetch = 0 : i64, scratch_operands = 0 : i64, tpu.core_type = #tpu.core_type<tc>, window_params = [{transform_indices = @transform_0, window_bounds = array<i64: 16, 8>}, {pipeline_mode = #tpu.pipeline_mode<synchronous>, transform_indices = @transform_1, window_bounds = array<i64: 8, 128>}, {pipeline_mode = #tpu.pipeline_mode<synchronous>, transform_indices = @transform_2, window_bounds = array<i64: 1, 128>}, {pipeline_mode = #tpu.pipeline_mode<synchronous>, transform_indices = @transform_3, window_bounds = array<i64: 128, 128>}, {pipeline_mode = #tpu.pipeline_mode<synchronous>, transform_indices = @transform_4, window_bounds = array<i64: 1, 128>}, {pipeline_mode = #tpu.pipeline_mode<synchronous>, transform_indices = @transform_5, window_bounds = array<i64: 128, 8>}, {pipeline_mode = #tpu.pipeline_mode<synchronous>, transform_indices = @transform_6, window_bounds = array<i64: 1, 8>}, {transform_indices = @transform_7, window_bounds = array<i64: 16, 8>}]} {
    %c0 = arith.constant 0 : index
    %c0_0 = arith.constant 0 : index
    %0 = vector.load %arg1[%c0, %c0_0] : memref<16x8xbf16, #tpu.memory_space<vmem>>, vector<16x8xbf16>
    %c0_1 = arith.constant 0 : index
    %c0_2 = arith.constant 0 : index
    %1 = vector.load %arg2[%c0_1, %c0_2] : memref<8x128xbf16, #tpu.memory_space<vmem>>, vector<8x128xbf16>
    %cst = arith.constant dense<0.000000e+00> : vector<16x128xf32>
    %2 = tpu.matmul %0, %1, %cst {dimension_numbers = #tpu.dot_dimension_numbers<[1], [0], [0], [1], [0, 0, 1, 1], [], []>} : vector<16x8xbf16>, vector<8x128xbf16>, vector<16x128xf32> -> vector<16x128xf32>
    %c0_3 = arith.constant 0 : index
    %c0_4 = arith.constant 0 : index
    %3 = vector.load %arg3[%c0_3, %c0_4] : memref<1x128xf32, #tpu.memory_space<vmem>>, vector<1x128xf32>
    %4 = vector.broadcast %3 : vector<1x128xf32> to vector<16x128xf32>
    %5 = arith.addf %2, %4 : vector<16x128xf32>
    %cst_5 = arith.constant 0.000000e+00 : f32
    %6 = vector.broadcast %cst_5 : f32 to vector<16x128xf32>
    %7 = arith.maximumf %5, %6 : vector<16x128xf32>
    %8 = arith.truncf %7 : vector<16x128xf32> to vector<16x128xbf16>
    %c0_6 = arith.constant 0 : index
    %c0_7 = arith.constant 0 : index
    %9 = vector.load %arg4[%c0_6, %c0_7] : memref<128x128xbf16, #tpu.memory_space<vmem>>, vector<128x128xbf16>
    %cst_8 = arith.constant dense<0.000000e+00> : vector<16x128xf32>
    %10 = tpu.matmul %8, %9, %cst_8 {dimension_numbers = #tpu.dot_dimension_numbers<[1], [0], [0], [1], [0, 0, 1, 1], [], []>} : vector<16x128xbf16>, vector<128x128xbf16>, vector<16x128xf32> -> vector<16x128xf32>
    %c0_9 = arith.constant 0 : index
    %c0_10 = arith.constant 0 : index
    %11 = vector.load %arg5[%c0_9, %c0_10] : memref<1x128xf32, #tpu.memory_space<vmem>>, vector<1x128xf32>
    %12 = vector.broadcast %11 : vector<1x128xf32> to vector<16x128xf32>
    %13 = arith.addf %10, %12 : vector<16x128xf32>
    %cst_11 = arith.constant 0.000000e+00 : f32
    %14 = vector.broadcast %cst_11 : f32 to vector<16x128xf32>
    %15 = arith.maximumf %13, %14 : vector<16x128xf32>
    %16 = arith.truncf %15 : vector<16x128xf32> to vector<16x128xbf16>
    %c0_12 = arith.constant 0 : index
    %c0_13 = arith.constant 0 : index
    %17 = vector.load %arg6[%c0_12, %c0_13] : memref<128x8xbf16, #tpu.memory_space<vmem>>, vector<128x8xbf16>
    %cst_14 = arith.constant dense<0.000000e+00> : vector<16x8xf32>
    %18 = tpu.matmul %16, %17, %cst_14 {dimension_numbers = #tpu.dot_dimension_numbers<[1], [0], [0], [1], [0, 0, 1, 1], [], []>} : vector<16x128xbf16>, vector<128x8xbf16>, vector<16x8xf32> -> vector<16x8xf32>
    %c0_15 = arith.constant 0 : index
    %c0_16 = arith.constant 0 : index
    %19 = vector.load %arg7[%c0_15, %c0_16] : memref<1x8xf32, #tpu.memory_space<vmem>>, vector<1x8xf32>
    %20 = vector.broadcast %19 : vector<1x8xf32> to vector<16x8xf32>
    %21 = arith.addf %18, %20 : vector<16x8xf32>
    %c0_17 = arith.constant 0 : index
    %c0_18 = arith.constant 0 : index
    %22 = vector.load %arg8[%c0_17, %c0_18] : memref<16x8xf32, #tpu.memory_space<vmem>>, vector<16x8xf32>
    tpu.vector_store %arg8[%c0_17, %c0_18], %21 {strides = array<i32>} : memref<16x8xf32, #tpu.memory_space<vmem>>, vector<16x8xf32>,
    return
  }
  func.func @transform_0(%arg0: i32) -> (i32, i32) {
    %c0_i32 = arith.constant 0 : i32
    %c0_i32_0 = arith.constant 0 : i32
    return %arg0, %c0_i32 : i32, i32
  }
  func.func @transform_1(%arg0: i32) -> (i32, i32) {
    %c0_i32 = arith.constant 0 : i32
    %c0_i32_0 = arith.constant 0 : i32
    %c0_i32_1 = arith.constant 0 : i32
    return %c0_i32, %c0_i32_0 : i32, i32
  }
  func.func @transform_2(%arg0: i32) -> (i32, i32) {
    %c0_i32 = arith.constant 0 : i32
    %c0_i32_0 = arith.constant 0 : i32
    %c0_i32_1 = arith.constant 0 : i32
    return %c0_i32, %c0_i32_0 : i32, i32
  }
  func.func @transform_3(%arg0: i32) -> (i32, i32) {
    %c0_i32 = arith.constant 0 : i32
    %c0_i32_0 = arith.constant 0 : i32
    %c0_i32_1 = arith.constant 0 : i32
    return %c0_i32, %c0_i32_0 : i32, i32
  }
  func.func @transform_4(%arg0: i32) -> (i32, i32) {
    %c0_i32 = arith.constant 0 : i32
    %c0_i32_0 = arith.constant 0 : i32
    %c0_i32_1 = arith.constant 0 : i32
    return %c0_i32, %c0_i32_0 : i32, i32
  }
  func.func @transform_5(%arg0: i32) -> (i32, i32) {
    %c0_i32 = arith.constant 0 : i32
    %c0_i32_0 = arith.constant 0 : i32
    %c0_i32_1 = arith.constant 0 : i32
    return %c0_i32, %c0_i32_0 : i32, i32
  }
  func.func @transform_6(%arg0: i32) -> (i32, i32) {
    %c0_i32 = arith.constant 0 : i32
    %c0_i32_0 = arith.constant 0 : i32
    %c0_i32_1 = arith.constant 0 : i32
    return %c0_i32, %c0_i32_0 : i32, i32
  }
  func.func @transform_7(%arg0: i32) -> (i32, i32) {
    %c0_i32 = arith.constant 0 : i32
    %c0_i32_0 = arith.constant 0 : i32
    return %arg0, %c0_i32 : i32, i32
  }
}

</mosaic_0001>

<bundles_post_ra>
// kernel: tpu_custom_call.1
= control target key start
LH: loop header
LB: loop body
LE: loop exit
PB: predicated region body
PF: predicated region fallthrough
CT: control target
= control target key end

     0   :  { %vm46_vm0 = vcmask 1043456   ;;  %v433_v0 = vmov 0.0   ;;  %vm434_vm1 = vmmov 0   ;;  %vm42_vm2 = vcmask 64512   ;;  %s567_s1 = inlined_call_operand.vmem [shape: bf16[8,128], index: 1, kind: input, shape index: {}]   ;;  %s568_s0 = inlined_call_operand.vmem [shape: bf16[16,8], index: 0, kind: input, shape index: {}]   ;;  %s569_s3 = inlined_call_operand.vmem [shape: bf16[128,128], index: 3, kind: input, shape index: {}]   ;;  %s570_s5 = inlined_call_operand.vmem [shape: bf16[128,8], index: 5, kind: input, shape index: {}]   ;;  %s571_s2 = inlined_call_operand.vmem [shape: f32[1,128], index: 2, kind: input, shape index: {}]   ;;  %s572_s4 = inlined_call_operand.vmem [shape: f32[1,128], index: 4, kind: input, shape index: {}]   ;;  %s573_s6 = inlined_call_operand.vmem [shape: f32[1,8], index: 6, kind: input, shape index: {}]   ;;  %s574_s7 = inlined_call_operand.vmem [shape: f32[16,8], index: 7, kind: output, shape index: {}]  }
   0x1   :  { %368 = vmatprep.subr.bf16.mxu0 %v433_v0  ;;  %v29_v1 = vld [vmem:[%s567_s1] sm:$0xf]  ;;  %370 = vmatprep.mubr.msk.bf16.mxu0 %vm434_vm1, %v433_v0  ;;  %v418_v5 = vld [vmem:[%s569_s3 + $0x8] sm:$0xff]   ;;  %v419_v6 = vld [vmem:[%s569_s3 + $0x10] sm:$0xff]  }
   0x2   :  { %v48_v2 = vsel %vm46_vm0, %v29_v1, 0  ;;  %v416_v3 = vld [vmem:[%s568_s0] sm:$0xff]   ;;  %374 = vmatprep.subr.bf16.mxu1 %v433_v0  ;;  %390 = vmatprep.mubr.msk.bf16.mxu1 %vm434_vm1, %v433_v0  ;;  %v420_v7 = vld [vmem:[%s569_s3 + $0x18] sm:$0xff]   ;;  %v422_v9 = vld [vmem:[%s569_s3 + $0x28] sm:$0xff]  }
   0x3   :  { %369 = vmatpush3.bf16.msra.mxu0 %v48_v2  ;;  %v417_v4 = vld [vmem:[%s569_s3] sm:$0xff]   ;;  %v423_v10 = vld [vmem:[%s569_s3 + $0x30] sm:$0xff]   ;;  %v424_v11 = vld [vmem:[%s569_s3 + $0x38] sm:$0xff]  }
   0x4   :  { %394 = vmatprep.subr.bf16.mxu0 %v433_v0  ;;  %375 = vmatpush3.bf16.msra.mxu1 %v417_v4  ;;  %v421_v8 = vld [vmem:[%s569_s3 + $0x20] sm:$0xff]   ;;  %v426_v13 = vld [vmem:[%s570_s5 + $0x8] sm:$0xff]   ;;  %v427_v14 = vld [vmem:[%s570_s5 + $0x10] sm:$0xff]  }
   0x5   :  { %376 = vmatprep.subr.bf16.mxu1 %v433_v0  ;;  %v425_v12 = vld [vmem:[%s570_s5] sm:$0xff]   ;;  %v428_v15 = vld [vmem:[%s570_s5 + $0x18] sm:$0xff]   ;;  %v430_v17 = vld [vmem:[%s570_s5 + $0x28] sm:$0xff]  }
   0x6   :  { %371 = vmatmul.mubr.msk.bf16.vlgmr.msra.gmra.mrb[0].mxu0 %vm42_vm2, %v416_v3  ;;  %v429_v16 = vld [vmem:[%s570_s5 + $0x20] sm:$0xff]   ;;  %v431_v28 = vld [vmem:[%s570_s5 + $0x30] sm:$0xff]   ;;  %v432_v29 = vld [vmem:[%s570_s5 + $0x38] sm:$0xff]  }
   0x7   :  { %410 = vmatprep.mubr.msk.bf16.mxu0 %vm434_vm1, %v433_v0  ;;  %395 = vmatpush3.bf16.msra.mxu0 %v425_v12  ;;  %v327_v18 = vld [vmem:[%s571_s2] ss:$0 sm:$0xff] }
   0x8   :  { %377 = vmatpush3.bf16.msra.mxu1 %v418_v5  ;;  %396 = vmatprep.subr.bf16.mxu0 %v433_v0  ;;  %v330_v30 = vld [vmem:[%s572_s4] ss:$0 sm:$0xff] }
   0x9   :  { %378 = vmatprep.subr.bf16.mxu1 %v433_v0  ;;  %v339_v40 = vld [vmem:[%s573_s6] ss:$0 sm:$0xff] }
   0xb   :  { %397 = vmatpush3.bf16.msra.mxu0 %v426_v13 }
   0xc   :  { %379 = vmatpush3.bf16.msra.mxu1 %v419_v6  ;;  %398 = vmatprep.subr.bf16.mxu0 %v433_v0 }
   0xd   :  { %380 = vmatprep.subr.bf16.mxu1 %v433_v0 }
   0xf   :  { %399 = vmatpush3.bf16.msra.mxu0 %v427_v14 }
  0x10   :  { %381 = vmatpush3.bf16.msra.mxu1 %v420_v7  ;;  %400 = vmatprep.subr.bf16.mxu0 %v433_v0 }
  0x11   :  { %382 = vmatprep.subr.bf16.mxu1 %v433_v0 }
  0x13   :  { %401 = vmatpush3.bf16.msra.mxu0 %v428_v15 }
  0x14   :  { %383 = vmatpush3.bf16.msra.mxu1 %v421_v8  ;;  %402 = vmatprep.subr.bf16.mxu0 %v433_v0 }
  0x15   :  { %384 = vmatprep.subr.bf16.mxu1 %v433_v0 }
  0x17   :  { %403 = vmatpush3.bf16.msra.mxu0 %v429_v16 }
  0x18   :  { %385 = vmatpush3.bf16.msra.mxu1 %v422_v9  ;;  %404 = vmatprep.subr.bf16.mxu0 %v433_v0 }
  0x19   :  { %386 = vmatprep.subr.bf16.mxu1 %v433_v0 }
  0x1b   :  { %405 = vmatpush3.bf16.msra.mxu0 %v430_v17 }
  0x1c   :  { %387 = vmatpush3.bf16.msra.mxu1 %v423_v10  ;;  %406 = vmatprep.subr.bf16.mxu0 %v433_v0 }
  0x1d   :  { %388 = vmatprep.subr.bf16.mxu1 %v433_v0 }
  0x1f   :  { %407 = vmatpush3.bf16.msra.mxu0 %v431_v28 }
  0x20   :  { %389 = vmatpush3.bf16.msra.mxu1 %v424_v11  ;;  %408 = vmatprep.subr.bf16.mxu0 %v433_v0 }
  0x23   :  { %409 = vmatpush3.bf16.msra.mxu0 %v432_v29 }
  0xd9   :  { %v84_v19 = vpop.f32.mrb[0].mxu0 }
  0xda   :  { %v85_v20 = vadd.f32 %v327_v18, %v84_v19  ;;  %v372_v21 = vpop.f32.mrb[1].mxu0 }
  0xdb   :  { %v87_v22 = vpop.f32.mrb[2].mxu0 }
  0xdc   :  { %v88_v23 = vadd.f32 %v327_v18, %v87_v22  ;;  %v373_v24 = vpop.f32.mrb[3].mxu0  ;;  %v91_v25 = vmax.f32 %v85_v20, 0.0 }
  0xde   :  { %v92_v26 = vmax.f32 %v88_v23, 0.0 }
  0xe0   :  { %v93_v27 = vpack.c.bf16 %v92_v26, %v91_v25 }
  0xe2   :  { %391 = vmatmul.mubr.bf16.vlgmr.msra.gmra.mrb[0].mxu1 %v93_v27 }
 0x1b5   :  { %v199_v31 = vpop.f32.mrb[0].mxu1 }
 0x1b6   :  { %v200_v32 = vadd.f32 %v330_v30, %v199_v31  ;;  %v392_v33 = vpop.f32.mrb[1].mxu1 }
 0x1b7   :  { %v202_v34 = vpop.f32.mrb[2].mxu1 }
 0x1b8   :  { %v203_v35 = vadd.f32 %v330_v30, %v202_v34  ;;  %v393_v36 = vpop.f32.mrb[3].mxu1  ;;  %v206_v37 = vmax.f32 %v200_v32, 0.0 }
 0x1ba   :  { %v207_v38 = vmax.f32 %v203_v35, 0.0 }
 0x1bc   :  { %v208_v39 = vpack.c.bf16 %v207_v38, %v206_v37 }
 0x1be   :  { %411 = vmatmul.mubr.bf16.vlgmr.msra.gmra.mrb[4].mxu0 %v208_v39 }
 0x291   :  { %v314_v41 = vpop.f32.mrb[4].mxu0 }
 0x292   :  { %v315_v42 = vadd.f32 %v339_v40, %v314_v41  ;;  %v412_v43 = vpop.f32.mrb[5].mxu0 }
 0x293   :  { %v317_v44 = vpop.f32.mrb[6].mxu0 }
 0x294   :  { %321 = vst.msk [vmem:[%s574_s7] sm:$0xff] %vm42_vm2, %v315_v42  ;;  %v318_v45 = vadd.f32 %v339_v40, %v317_v44  ;;  %v413_v46 = vpop.f32.mrb[7].mxu0 }
 0x296   :  { %322 = vst.msk [vmem:[%s574_s7 + $0x8] sm:$0xff] %vm42_vm2, %v318_v45 }

</bundles_post_ra>
